<compile_context>
chip_gen: v7x
topology: tpu7x:2x2x1
jax: 0.10.0
libtpu: 0.0.40
codegen_flags: <defaults>
</compile_context>

<pallas_src>
import functools

import jax
import jax.numpy as jnp
from jax.experimental import pallas as pl
from jax.experimental.pallas import tpu as pltpu


def _round_up(n, m):
    return ((n + m - 1) // m) * m


def _pick_tile_b(B):
    if B <= 256:
        return B
    for cand in (256, 128, 64, 32, 16, 8):
        if B % cand == 0:
            return cand
    return B


def rnn_kernel(x_ref, wbig_ref, bfold_ref, w2b_ref, w3_ref, b3_ref, y_ref,
               p_ref, *, nsteps, tile_b, hp):
    """One batch tile of the RNN forward.

    x_ref     : (tile_b, nsteps*Din)      bf16, raw layout of the input
    wbig_ref  : (nsteps*Din, nsteps*Hp)   bf16, kron(I_nsteps, W12_pad)
    bfold_ref : (1, nsteps*Hp)            f32,  tiled (b1 @ W2a^T + b2), padded
    w2b_ref   : (Hp, Hp)                  bf16, fc2 columns acting on state
    w3_ref    : (Hp, Dp)                  bf16, fc3 weight (transposed, padded)
    b3_ref    : (1, Dp)                   f32
    y_ref     : (tile_b, Dp)              f32
    p_ref     : (tile_b, nsteps*Hp)       f32 VMEM scratch
    """
    # Single bf16 matmul for everything that does not depend on the recurrent
    # state (entirely off the serial chain); result parked in VMEM scratch.
    p_ref[...] = (jnp.dot(x_ref[...], wbig_ref[...],
                          preferred_element_type=jnp.float32)
                  + bfold_ref[...])

    # Hoist the recurrent weight load out of the loop.
    w2b = w2b_ref[...]

    state = jnp.zeros((tile_b, hp), dtype=jnp.float32)

    # Serial recurrence: one small bf16 matmul + f32 add + ReLU per step.
    # nsteps is small & static -> static loop; p_t loads are static,
    # 128-aligned lane slices of the scratch (no big live value).
    for t in range(nsteps):
        p_t = p_ref[:, t * hp:(t + 1) * hp]
        s = p_t + jnp.dot(state.astype(jnp.bfloat16), w2b,
                          preferred_element_type=jnp.float32)
        state = jnp.maximum(s, 0.0)                      # ReLU, f32

    y_ref[...] = (jnp.dot(state.astype(jnp.bfloat16), w3_ref[...],
                          preferred_element_type=jnp.float32)
                  + b3_ref[...]).astype(y_ref.dtype)


def rnn_forward(x, params, *, diminput, dimhidden, dimoutput, nsteps,
                tile_b=None):
    B = x.shape[0]
    assert x.shape[1] == nsteps * diminput
    H = dimhidden
    Hp = _round_up(H, 128)        # lane-dense hidden width
    Dp = _round_up(dimoutput, 128)  # lane-dense output width

    if tile_b is None:
        # Largest tile that fits comfortably; on v7x, passing tile_b=B//2
        # (multiple of 8) gives both TensorCores work when B is large enough.
        tile_b = _pick_tile_b(B)
    assert B % tile_b == 0, "batch must be divisible by the batch tile"
    num_tiles = B // tile_b
    assert num_tiles == 1 or tile_b % 8 == 0, "tiled batch must be sublane-aligned"

    w1, b1, w2, b2, w3, b3 = params

    # --- algebraic fold (exact, done in f32, cast to bf16 afterwards) -------
    w2a_t = w2[:, :H].T                                   # (H, H) acts on h
    w2b_t = w2[:, H:].T                                   # (H, H) acts on state
    w12 = (w1.T @ w2a_t).astype(jnp.float32)              # (Din, H)
    b_fold = (b1 @ w2a_t + b2).astype(jnp.float32)        # (H,)

    # --- lane padding to 128 + bf16 casts for MXU operands ------------------
    w12_p = jnp.zeros((diminput, Hp), jnp.float32).at[:, :H].set(w12)
    # Block-diagonal "all steps at once" weight: col-block t == W12_pad.
    wbig = jnp.kron(jnp.eye(nsteps, dtype=jnp.float32), w12_p).astype(jnp.bfloat16)

    b_fold_p = jnp.zeros((Hp,), jnp.float32).at[:H].set(b_fold)
    bfold_tiled = jnp.tile(b_fold_p, nsteps).reshape(1, nsteps * Hp)

    w2b_p = (jnp.zeros((Hp, Hp), jnp.float32).at[:H, :H].set(w2b_t)
             .astype(jnp.bfloat16))
    w3_p = (jnp.zeros((Hp, Dp), jnp.float32).at[:H, :dimoutput].set(w3.T)
            .astype(jnp.bfloat16))
    b3_p = jnp.zeros((1, Dp), jnp.float32).at[0, :dimoutput].set(b3)

    x_bf = x.astype(jnp.bfloat16)                         # halves x DMA bytes

    # --- VMEM budget / cost estimate ----------------------------------------
    est_bytes = (2 * (tile_b * nsteps * diminput * 2        # x (double-buffered)
                      + wbig.size * 2 + w2b_p.size * 2 + w3_p.size * 2
                      + bfold_tiled.size * 4 + b3_p.size * 4
                      + tile_b * Dp * 4)                     # y
                 + tile_b * nsteps * Hp * 4)                 # p scratch
    vmem_limit_bytes = int(min(max(2 * est_bytes, 32 * 2**20), 60 * 2**20))

    flops = (2 * B * (nsteps * diminput) * (nsteps * Hp)
             + 2 * B * nsteps * Hp * Hp
             + 2 * B * Hp * Dp)
    bytes_accessed = (x_bf.size * 2 + wbig.size * 2 + w2b_p.size * 2
                      + w3_p.size * 2 + bfold_tiled.size * 4 + b3_p.size * 4
                      + B * Dp * 4)

    kernel = functools.partial(rnn_kernel, nsteps=nsteps, tile_b=tile_b, hp=Hp)
    y_pad = pl.pallas_call(
        kernel,
        out_shape=jax.ShapeDtypeStruct((B, Dp), jnp.float32),
        grid=(num_tiles,),
        in_specs=[
            # x: blocked on batch only; feature layout untouched (no wrapper
            # transpose / extra HBM pass).
            pl.BlockSpec((tile_b, nsteps * diminput), lambda i: (i, 0)),
            # Weights/biases: same block every grid step -> VMEM-resident.
            pl.BlockSpec((nsteps * diminput, nsteps * Hp), lambda i: (0, 0)),
            pl.BlockSpec((1, nsteps * Hp), lambda i: (0, 0)),
            pl.BlockSpec((Hp, Hp), lambda i: (0, 0)),
            pl.BlockSpec((Hp, Dp), lambda i: (0, 0)),
            pl.BlockSpec((1, Dp), lambda i: (0, 0)),
        ],
        out_specs=pl.BlockSpec((tile_b, Dp), lambda i: (i, 0)),
        scratch_shapes=[pltpu.VMEM((tile_b, nsteps * Hp), jnp.float32)],
        compiler_params=pltpu.CompilerParams(
            dimension_semantics=("parallel",),
            vmem_limit_bytes=vmem_limit_bytes),
        cost_estimate=pl.CostEstimate(flops=int(flops), transcendentals=0,
                                      bytes_accessed=int(bytes_accessed)),
    )(x_bf, wbig, bfold_tiled, w2b_p, w3_p, b3_p)

    return y_pad[:, :dimoutput]


def rnn_reference(x, params, *, diminput, dimhidden, dimoutput, nsteps):
    """Pure-JAX f32 mirror of the PyTorch forward (unfused), for checking."""
    w1, b1, w2, b2, w3, b3 = params
    B = x.shape[0]
    state = jnp.zeros((B, dimhidden), jnp.float32)
    for t in range(nsteps):
        cur_x = x[:, t * diminput:(t + 1) * diminput]
        h = cur_x @ w1.T + b1
        s = jnp.concatenate([h, state], axis=1) @ w2.T + b2
        state = jax.nn.relu(s)
    return state @ w3.T + b3


def init_params(key, diminput, dimhidden, dimoutput):
    """Deterministic init mimicking nn.Linear default (uniform +-1/sqrt(fan_in))."""
    ks = jax.random.split(key, 6)

    def lin(kw, kb, fan_in, fan_out):
        bound = 1.0 / jnp.sqrt(fan_in)
        w = jax.random.uniform(kw, (fan_out, fan_in), jnp.float32, -bound, bound)
        b = jax.random.uniform(kb, (fan_out,), jnp.float32, -bound, bound)
        return w, b

    w1, b1 = lin(ks[0], ks[1], diminput, dimhidden)
    w2, b2 = lin(ks[2], ks[3], dimhidden * 2, dimhidden)
    w3, b3 = lin(ks[4], ks[5], dimhidden, dimoutput)
    return (w1, b1, w2, b2, w3, b3)


if __name__ == "__main__":
    diminput, dimoutput, dimhidden, nsteps = 16, 10, 32, 8
    batch = 8

    key = jax.random.PRNGKey(0)
    kx, kp = jax.random.split(key)
    x = jax.random.normal(kx, (batch, nsteps * diminput), jnp.float32)
    params = init_params(kp, diminput, dimhidden, dimoutput)

    y = rnn_forward(x, params, diminput=diminput, dimhidden=dimhidden,
                    dimoutput=dimoutput, nsteps=nsteps)
    y = jax.block_until_ready(y)

    y_ref = rnn_reference(x, params, diminput=diminput, dimhidden=dimhidden,
                          dimoutput=dimoutput, nsteps=nsteps)
    assert y.shape == (batch, dimoutput)
    # bf16 MXU operands + fused W1*W2a change rounding slightly; chain is short
    # and state/bias math stays f32, so errors stay well under 2e-2.
    assert jnp.allclose(y, y_ref, atol=2e-2, rtol=2e-2), (
        "mismatch vs reference: max abs err = "
        f"{float(jnp.max(jnp.abs(y - y_ref)))}")

    print("KERNEL_OK")
</pallas_src>

<mosaic_0001>
module attributes {stable_mosaic.version = 11 : i64} {
  func.func @rnn_kernel(%arg0: i32, %arg1: memref<8x128xbf16, #tpu.memory_space<vmem>>, %arg2: memref<128x1024xbf16, #tpu.memory_space<vmem>>, %arg3: memref<1x1024xf32, #tpu.memory_space<vmem>>, %arg4: memref<128x128xbf16, #tpu.memory_space<vmem>>, %arg5: memref<128x128xbf16, #tpu.memory_space<vmem>>, %arg6: memref<1x128xf32, #tpu.memory_space<vmem>>, %arg7: memref<8x128xf32, #tpu.memory_space<vmem>>, %arg8: memref<8x1024xf32, #tpu.memory_space<vmem>>) attributes {dimension_semantics = [#tpu.dimension_semantics<parallel>], iteration_bounds = array<i64: 1>, scalar_prefetch = 0 : i64, scratch_operands = 1 : i64, tpu.core_type = #tpu.core_type<tc>, window_params = [{transform_indices = @transform_0, window_bounds = array<i64: 8, 128>}, {pipeline_mode = #tpu.pipeline_mode<synchronous>, transform_indices = @transform_1, window_bounds = array<i64: 128, 1024>}, {pipeline_mode = #tpu.pipeline_mode<synchronous>, transform_indices = @transform_2, window_bounds = array<i64: 1, 1024>}, {pipeline_mode = #tpu.pipeline_mode<synchronous>, transform_indices = @transform_3, window_bounds = array<i64: 128, 128>}, {pipeline_mode = #tpu.pipeline_mode<synchronous>, transform_indices = @transform_4, window_bounds = array<i64: 128, 128>}, {pipeline_mode = #tpu.pipeline_mode<synchronous>, transform_indices = @transform_5, window_bounds = array<i64: 1, 128>}, {transform_indices = @transform_6, window_bounds = array<i64: 8, 128>}]} {
    %c0 = arith.constant 0 : index
    %c0_0 = arith.constant 0 : index
    %0 = vector.load %arg1[%c0, %c0_0] : memref<8x128xbf16, #tpu.memory_space<vmem>>, vector<8x128xbf16>
    %c0_1 = arith.constant 0 : index
    %c0_2 = arith.constant 0 : index
    %1 = vector.load %arg2[%c0_1, %c0_2] : memref<128x1024xbf16, #tpu.memory_space<vmem>>, vector<128x1024xbf16>
    %cst = arith.constant dense<0.000000e+00> : vector<8x1024xf32>
    %2 = tpu.matmul %0, %1, %cst {dimension_numbers = #tpu.dot_dimension_numbers<[1], [0], [0], [1], [0, 0, 1, 1], [], []>} : vector<8x128xbf16>, vector<128x1024xbf16>, vector<8x1024xf32> -> vector<8x1024xf32>
    %c0_3 = arith.constant 0 : index
    %c0_4 = arith.constant 0 : index
    %3 = vector.load %arg3[%c0_3, %c0_4] : memref<1x1024xf32, #tpu.memory_space<vmem>>, vector<1x1024xf32>
    %4 = vector.broadcast %3 : vector<1x1024xf32> to vector<8x1024xf32>
    %5 = arith.addf %2, %4 : vector<8x1024xf32>
    %c0_5 = arith.constant 0 : index
    %c0_6 = arith.constant 0 : index
    %6 = vector.load %arg8[%c0_5, %c0_6] : memref<8x1024xf32, #tpu.memory_space<vmem>>, vector<8x1024xf32>
    tpu.vector_store %arg8[%c0_5, %c0_6], %5 {strides = array<i32>} : memref<8x1024xf32, #tpu.memory_space<vmem>>, vector<8x1024xf32>,
    %c0_7 = arith.constant 0 : index
    %c0_8 = arith.constant 0 : index
    %7 = vector.load %arg4[%c0_7, %c0_8] : memref<128x128xbf16, #tpu.memory_space<vmem>>, vector<128x128xbf16>
    %cst_9 = arith.constant 0.000000e+00 : f32
    %8 = vector.broadcast %cst_9 : f32 to vector<8x128xf32>
    %c0_10 = arith.constant 0 : index
    %c0_11 = arith.constant 0 : index
    %9 = vector.load %arg8[%c0_10, %c0_11] : memref<8x1024xf32, #tpu.memory_space<vmem>>, vector<8x128xf32>
    %10 = arith.truncf %8 : vector<8x128xf32> to vector<8x128xbf16>
    %cst_12 = arith.constant dense<0.000000e+00> : vector<8x128xf32>
    %11 = tpu.matmul %10, %7, %cst_12 {dimension_numbers = #tpu.dot_dimension_numbers<[1], [0], [0], [1], [0, 0, 1, 1], [], []>} : vector<8x128xbf16>, vector<128x128xbf16>, vector<8x128xf32> -> vector<8x128xf32>
    %12 = arith.addf %9, %11 : vector<8x128xf32>
    %cst_13 = arith.constant 0.000000e+00 : f32
    %13 = vector.broadcast %cst_13 : f32 to vector<8x128xf32>
    %14 = arith.maximumf %12, %13 : vector<8x128xf32>
    %c0_14 = arith.constant 0 : index
    %c128 = arith.constant 128 : index
    %15 = vector.load %arg8[%c0_14, %c128] : memref<8x1024xf32, #tpu.memory_space<vmem>>, vector<8x128xf32>
    %16 = arith.truncf %14 : vector<8x128xf32> to vector<8x128xbf16>
    %cst_15 = arith.constant dense<0.000000e+00> : vector<8x128xf32>
    %17 = tpu.matmul %16, %7, %cst_15 {dimension_numbers = #tpu.dot_dimension_numbers<[1], [0], [0], [1], [0, 0, 1, 1], [], []>} : vector<8x128xbf16>, vector<128x128xbf16>, vector<8x128xf32> -> vector<8x128xf32>
    %18 = arith.addf %15, %17 : vector<8x128xf32>
    %cst_16 = arith.constant 0.000000e+00 : f32
    %19 = vector.broadcast %cst_16 : f32 to vector<8x128xf32>
    %20 = arith.maximumf %18, %19 : vector<8x128xf32>
    %c0_17 = arith.constant 0 : index
    %c256 = arith.constant 256 : index
    %21 = vector.load %arg8[%c0_17, %c256] : memref<8x1024xf32, #tpu.memory_space<vmem>>, vector<8x128xf32>
    %22 = arith.truncf %20 : vector<8x128xf32> to vector<8x128xbf16>
    %cst_18 = arith.constant dense<0.000000e+00> : vector<8x128xf32>
    %23 = tpu.matmul %22, %7, %cst_18 {dimension_numbers = #tpu.dot_dimension_numbers<[1], [0], [0], [1], [0, 0, 1, 1], [], []>} : vector<8x128xbf16>, vector<128x128xbf16>, vector<8x128xf32> -> vector<8x128xf32>
    %24 = arith.addf %21, %23 : vector<8x128xf32>
    %cst_19 = arith.constant 0.000000e+00 : f32
    %25 = vector.broadcast %cst_19 : f32 to vector<8x128xf32>
    %26 = arith.maximumf %24, %25 : vector<8x128xf32>
    %c0_20 = arith.constant 0 : index
    %c384 = arith.constant 384 : index
    %27 = vector.load %arg8[%c0_20, %c384] : memref<8x1024xf32, #tpu.memory_space<vmem>>, vector<8x128xf32>
    %28 = arith.truncf %26 : vector<8x128xf32> to vector<8x128xbf16>
    %cst_21 = arith.constant dense<0.000000e+00> : vector<8x128xf32>
    %29 = tpu.matmul %28, %7, %cst_21 {dimension_numbers = #tpu.dot_dimension_numbers<[1], [0], [0], [1], [0, 0, 1, 1], [], []>} : vector<8x128xbf16>, vector<128x128xbf16>, vector<8x128xf32> -> vector<8x128xf32>
    %30 = arith.addf %27, %29 : vector<8x128xf32>
    %cst_22 = arith.constant 0.000000e+00 : f32
    %31 = vector.broadcast %cst_22 : f32 to vector<8x128xf32>
    %32 = arith.maximumf %30, %31 : vector<8x128xf32>
    %c0_23 = arith.constant 0 : index
    %c512 = arith.constant 512 : index
    %33 = vector.load %arg8[%c0_23, %c512] : memref<8x1024xf32, #tpu.memory_space<vmem>>, vector<8x128xf32>
    %34 = arith.truncf %32 : vector<8x128xf32> to vector<8x128xbf16>
    %cst_24 = arith.constant dense<0.000000e+00> : vector<8x128xf32>
    %35 = tpu.matmul %34, %7, %cst_24 {dimension_numbers = #tpu.dot_dimension_numbers<[1], [0], [0], [1], [0, 0, 1, 1], [], []>} : vector<8x128xbf16>, vector<128x128xbf16>, vector<8x128xf32> -> vector<8x128xf32>
    %36 = arith.addf %33, %35 : vector<8x128xf32>
    %cst_25 = arith.constant 0.000000e+00 : f32
    %37 = vector.broadcast %cst_25 : f32 to vector<8x128xf32>
    %38 = arith.maximumf %36, %37 : vector<8x128xf32>
    %c0_26 = arith.constant 0 : index
    %c640 = arith.constant 640 : index
    %39 = vector.load %arg8[%c0_26, %c640] : memref<8x1024xf32, #tpu.memory_space<vmem>>, vector<8x128xf32>
    %40 = arith.truncf %38 : vector<8x128xf32> to vector<8x128xbf16>
    %cst_27 = arith.constant dense<0.000000e+00> : vector<8x128xf32>
    %41 = tpu.matmul %40, %7, %cst_27 {dimension_numbers = #tpu.dot_dimension_numbers<[1], [0], [0], [1], [0, 0, 1, 1], [], []>} : vector<8x128xbf16>, vector<128x128xbf16>, vector<8x128xf32> -> vector<8x128xf32>
    %42 = arith.addf %39, %41 : vector<8x128xf32>
    %cst_28 = arith.constant 0.000000e+00 : f32
    %43 = vector.broadcast %cst_28 : f32 to vector<8x128xf32>
    %44 = arith.maximumf %42, %43 : vector<8x128xf32>
    %c0_29 = arith.constant 0 : index
    %c768 = arith.constant 768 : index
    %45 = vector.load %arg8[%c0_29, %c768] : memref<8x1024xf32, #tpu.memory_space<vmem>>, vector<8x128xf32>
    %46 = arith.truncf %44 : vector<8x128xf32> to vector<8x128xbf16>
    %cst_30 = arith.constant dense<0.000000e+00> : vector<8x128xf32>
    %47 = tpu.matmul %46, %7, %cst_30 {dimension_numbers = #tpu.dot_dimension_numbers<[1], [0], [0], [1], [0, 0, 1, 1], [], []>} : vector<8x128xbf16>, vector<128x128xbf16>, vector<8x128xf32> -> vector<8x128xf32>
    %48 = arith.addf %45, %47 : vector<8x128xf32>
    %cst_31 = arith.constant 0.000000e+00 : f32
    %49 = vector.broadcast %cst_31 : f32 to vector<8x128xf32>
    %50 = arith.maximumf %48, %49 : vector<8x128xf32>
    %c0_32 = arith.constant 0 : index
    %c896 = arith.constant 896 : index
    %51 = vector.load %arg8[%c0_32, %c896] : memref<8x1024xf32, #tpu.memory_space<vmem>>, vector<8x128xf32>
    %52 = arith.truncf %50 : vector<8x128xf32> to vector<8x128xbf16>
    %cst_33 = arith.constant dense<0.000000e+00> : vector<8x128xf32>
    %53 = tpu.matmul %52, %7, %cst_33 {dimension_numbers = #tpu.dot_dimension_numbers<[1], [0], [0], [1], [0, 0, 1, 1], [], []>} : vector<8x128xbf16>, vector<128x128xbf16>, vector<8x128xf32> -> vector<8x128xf32>
    %54 = arith.addf %51, %53 : vector<8x128xf32>
    %cst_34 = arith.constant 0.000000e+00 : f32
    %55 = vector.broadcast %cst_34 : f32 to vector<8x128xf32>
    %56 = arith.maximumf %54, %55 : vector<8x128xf32>
    %57 = arith.truncf %56 : vector<8x128xf32> to vector<8x128xbf16>
    %c0_35 = arith.constant 0 : index
    %c0_36 = arith.constant 0 : index
    %58 = vector.load %arg5[%c0_35, %c0_36] : memref<128x128xbf16, #tpu.memory_space<vmem>>, vector<128x128xbf16>
    %cst_37 = arith.constant dense<0.000000e+00> : vector<8x128xf32>
    %59 = tpu.matmul %57, %58, %cst_37 {dimension_numbers = #tpu.dot_dimension_numbers<[1], [0], [0], [1], [0, 0, 1, 1], [], []>} : vector<8x128xbf16>, vector<128x128xbf16>, vector<8x128xf32> -> vector<8x128xf32>
    %c0_38 = arith.constant 0 : index
    %c0_39 = arith.constant 0 : index
    %60 = vector.load %arg6[%c0_38, %c0_39] : memref<1x128xf32, #tpu.memory_space<vmem>>, vector<1x128xf32>
    %61 = vector.broadcast %60 : vector<1x128xf32> to vector<8x128xf32>
    %62 = arith.addf %59, %61 : vector<8x128xf32>
    %c0_40 = arith.constant 0 : index
    %c0_41 = arith.constant 0 : index
    %63 = vector.load %arg7[%c0_40, %c0_41] : memref<8x128xf32, #tpu.memory_space<vmem>>, vector<8x128xf32>
    tpu.vector_store %arg7[%c0_40, %c0_41], %62 {strides = array<i32>} : memref<8x128xf32, #tpu.memory_space<vmem>>, vector<8x128xf32>,
    return
  }
  func.func @transform_0(%arg0: i32) -> (i32, i32) {
    %c0_i32 = arith.constant 0 : i32
    %c0_i32_0 = arith.constant 0 : i32
    return %arg0, %c0_i32 : i32, i32
  }
  func.func @transform_1(%arg0: i32) -> (i32, i32) {
    %c0_i32 = arith.constant 0 : i32
    %c0_i32_0 = arith.constant 0 : i32
    %c0_i32_1 = arith.constant 0 : i32
    return %c0_i32, %c0_i32_0 : i32, i32
  }
  func.func @transform_2(%arg0: i32) -> (i32, i32) {
    %c0_i32 = arith.constant 0 : i32
    %c0_i32_0 = arith.constant 0 : i32
    %c0_i32_1 = arith.constant 0 : i32
    return %c0_i32, %c0_i32_0 : i32, i32
  }
  func.func @transform_3(%arg0: i32) -> (i32, i32) {
    %c0_i32 = arith.constant 0 : i32
    %c0_i32_0 = arith.constant 0 : i32
    %c0_i32_1 = arith.constant 0 : i32
    return %c0_i32, %c0_i32_0 : i32, i32
  }
  func.func @transform_4(%arg0: i32) -> (i32, i32) {
    %c0_i32 = arith.constant 0 : i32
    %c0_i32_0 = arith.constant 0 : i32
    %c0_i32_1 = arith.constant 0 : i32
    return %c0_i32, %c0_i32_0 : i32, i32
  }
  func.func @transform_5(%arg0: i32) -> (i32, i32) {
    %c0_i32 = arith.constant 0 : i32
    %c0_i32_0 = arith.constant 0 : i32
    %c0_i32_1 = arith.constant 0 : i32
    return %c0_i32, %c0_i32_0 : i32, i32
  }
  func.func @transform_6(%arg0: i32) -> (i32, i32) {
    %c0_i32 = arith.constant 0 : i32
    %c0_i32_0 = arith.constant 0 : i32
    return %arg0, %c0_i32 : i32, i32
  }
}

</mosaic_0001>

<bundles_post_ra>
// kernel: tpu_custom_call.1
= control target key start
LH: loop header
LB: loop body
LE: loop exit
PB: predicated region body
PF: predicated region fallthrough
CT: control target
= control target key end

     0   :  { %11 = vsyncpa [#allocation4], 0  ;;  %s2089_s0 = inlined_call_operand.hbm [shape: bf16[8,128], index: 0, kind: input, shape index: {}]   ;;  %s2090_s1 = inlined_call_operand.hbm [shape: bf16[128,1024], index: 1, kind: input, shape index: {}]   ;;  %s2091_s2 = inlined_call_operand.hbm [shape: f32[1,1024], index: 2, kind: input, shape index: {}]   ;;  %s2092_s3 = inlined_call_operand.hbm [shape: bf16[128,128], index: 3, kind: input, shape index: {}]   ;;  %s2093_s4 = inlined_call_operand.hbm [shape: bf16[128,128], index: 4, kind: input, shape index: {}]   ;;  %s2094_s5 = inlined_call_operand.vmem [shape: f32[1,128], index: 5, kind: input, shape index: {}]   ;;  %s2095_s6 = inlined_call_operand.hbm [shape: f32[8,128], index: 6, kind: output, shape index: {}]  }
   0x1   :  { %12 = vsyncpa [#allocation7], 0 }
   0x2   :  { %13 = vsyncpa [#allocation10], 0 }
   0x3   :  { %14 = vsyncpa [#allocation5], 0  ;;  %s1744_s21 = smov [#allocation6]   ;;  %s1604_s25 = scalar_lea.hbm %s2090_s1, 8192 }
   0x4   :  { %s30_s22 = sshll.u32 %s1744_s21, 4  ;;  %p1605_p0 = scmp.ne.s32.totalorder %s2090_s1, %s1604_s25  ;;  %s31_s22 = int_to_ptr.vmem [resolvable:$true] %s30_s22 }
   0x5   :  { %p1608_p1 = scmp.lt.u32.totalorder %s1604_s25, %s2090_s1 }
   0x7   :  { %p1610_p2 = pnand %p1608_p1, %p1605_p0 }
   0x9   :  { %1613 = shalt.err (!%p1610_p2)
}
   0xa   :  { %s1614_s30 = scalar_lea.vmem %s31_s22, 8192  ;;  %p1619_p4 = scmp.lt.s32.totalorder %s31_s22, %s31_s22 }
   0xb   :  { %p1615_p3 = scmp.ne.s32.totalorder %s31_s22, %s1614_s30  ;;  %p1620_p5 = scmp.lt.s32.totalorder %s1614_s30, %s1614_s30 }
   0xd   :  { %p1621_p6 = por %p1620_p5, %p1619_p4 }
   0xf   :  { %p1622_p7 = pnand %p1621_p6, %p1615_p3 }
  0x11   :  { %1625 = shalt.err (!%p1622_p7)
}
  0x12   :  { %s1745_s7 = smov 512   ;;  %s1746_s8 = smov 32  }
  0x13   :  { %36 = dma.hbm_to_vmem [thread:$0]  %s2090_s1, 8192, %s31_s22, [#allocation7], %s1745_s7, %s1745_s7, %s1746_s8  }
  0x14   :  { %s1747_s11 = smov [#allocation9]   ;;  %s1626_s15 = scalar_lea.hbm %s2092_s3, 1024 }
  0x15   :  { %s52_s12 = sshll.u32 %s1747_s11, 4  ;;  %p1627_p8 = scmp.ne.s32.totalorder %s2092_s3, %s1626_s15  ;;  %s53_s12 = int_to_ptr.vmem [resolvable:$true] %s52_s12 }
  0x16   :  { %p1630_p9 = scmp.lt.u32.totalorder %s1626_s15, %s2092_s3 }
  0x18   :  { %p1632_p10 = pnand %p1630_p9, %p1627_p8 }
  0x1a   :  { %1635 = shalt.err (!%p1632_p10)
}
  0x1b   :  { %s1636_s20 = scalar_lea.vmem %s53_s12, 1024  ;;  %p1641_p12 = scmp.lt.s32.totalorder %s53_s12, %s53_s12 }
  0x1c   :  { %p1637_p11 = scmp.ne.s32.totalorder %s53_s12, %s1636_s20  ;;  %p1642_p13 = scmp.lt.s32.totalorder %s1636_s20, %s1636_s20 }
  0x1e   :  { %p1643_p0 = por %p1642_p13, %p1641_p12 }
  0x20   :  { %p1644_p1 = pnand %p1643_p0, %p1637_p11 }
  0x22   :  { %1647 = shalt.err (!%p1644_p1)
}
  0x23   :  { %s1748_s1 = smov 64   ;;  %s1749_s21 = smov 4  }
  0x24   :  { %58 = dma.hbm_to_vmem [thread:$0]  %s2092_s3, 1024, %s53_s12, [#allocation10], %s1748_s1, %s1748_s1, %s1749_s21  }
  0x25   :  { %s1750_s24 = smov [#allocation3]   ;;  %s1751_s26 = smov [#allocation8]  }
  0x26   :  { %s21_s25 = sshll.u32 %s1750_s24, 4  ;;  %s43_s27 = sshll.u32 %s1751_s26, 4  ;;  %s22_s25 = int_to_ptr.vmem [resolvable:$true] %s21_s25  ;;  %s44_s27 = int_to_ptr.vmem [resolvable:$true] %s43_s27 }
  0x27   :  { %s1648_s30 = scalar_lea.hbm %s2089_s0, 64 }
  0x28   :  { %p1649_p2 = scmp.ne.s32.totalorder %s2089_s0, %s1648_s30  ;;  %p1652_p3 = scmp.lt.u32.totalorder %s1648_s30, %s2089_s0 }
  0x2a   :  { %p1654_p4 = pnand %p1652_p3, %p1649_p2 }
  0x2c   :  { %1657 = shalt.err (!%p1654_p4)
}
  0x2d   :  { %s1658_s3 = scalar_lea.vmem %s22_s25, 64  ;;  %p1663_p6 = scmp.lt.s32.totalorder %s22_s25, %s22_s25 }
  0x2e   :  { %p1659_p5 = scmp.ne.s32.totalorder %s22_s25, %s1658_s3  ;;  %p1664_p7 = scmp.lt.s32.totalorder %s1658_s3, %s1658_s3 }
  0x30   :  { %p1665_p8 = por %p1664_p7, %p1663_p6 }
  0x32   :  { %p1666_p9 = pnand %p1665_p8, %p1659_p5 }
  0x34   :  { %1669 = shalt.err (!%p1666_p9)
}
  0x35   :  { %24 = dma.hbm_to_vmem [thread:$0]  %s2089_s0, 64, %s22_s25, [#allocation4]  }
  0x36   :  { %s1670_s15 = scalar_lea.hbm %s2091_s2, 128 }
  0x37   :  { %p1671_p10 = scmp.ne.s32.totalorder %s2091_s2, %s1670_s15  ;;  %p1674_p11 = scmp.lt.u32.totalorder %s1670_s15, %s2091_s2 }
  0x39   :  { %p1676_p12 = pnand %p1674_p11, %p1671_p10 }
  0x3b   :  { %1679 = shalt.err (!%p1676_p12)
}
  0x3c   :  { %s1680_s20 = scalar_lea.vmem %s44_s27, 128  ;;  %p1685_p0 = scmp.lt.s32.totalorder %s44_s27, %s44_s27 }
  0x3d   :  { %p1681_p13 = scmp.ne.s32.totalorder %s44_s27, %s1680_s20  ;;  %p1686_p1 = scmp.lt.s32.totalorder %s1680_s20, %s1680_s20 }
  0x3f   :  { %p1687_p2 = por %p1686_p1, %p1685_p0 }
  0x41   :  { %p1688_p3 = pnand %p1687_p2, %p1681_p13 }
  0x43   :  { %1691 = shalt.err (!%p1688_p3)
}
  0x44   :  { %46 = dma.hbm_to_vmem [thread:$0]  %s2091_s2, 128, %s44_s27, [#allocation7]  }
  0x45   :  { %s1752_s23 = smov [#allocation11]   ;;  %s1692_s28 = scalar_lea.hbm %s2093_s4, 1024 }
  0x46   :  { %s64_s24 = sshll.u32 %s1752_s23, 4  ;;  %p1693_p4 = scmp.ne.s32.totalorder %s2093_s4, %s1692_s28  ;;  %s65_s24 = int_to_ptr.vmem [resolvable:$true] %s64_s24 }
  0x47   :  { %p1696_p5 = scmp.lt.u32.totalorder %s1692_s28, %s2093_s4 }
  0x49   :  { %p1698_p6 = pnand %p1696_p5, %p1693_p4 }
  0x4b   :  { %1701 = shalt.err (!%p1698_p6)
}
  0x4c   :  { %s1702_s9 = scalar_lea.vmem %s65_s24, 1024  ;;  %p1707_p8 = scmp.lt.s32.totalorder %s65_s24, %s65_s24 }
  0x4d   :  { %p1703_p7 = scmp.ne.s32.totalorder %s65_s24, %s1702_s9  ;;  %p1708_p9 = scmp.lt.s32.totalorder %s1702_s9, %s1702_s9 }
  0x4f   :  { %p1709_p10 = por %p1708_p9, %p1707_p8 }
  0x51   :  { %p1710_p11 = pnand %p1709_p10, %p1703_p7 }
  0x53   :  { %1713 = shalt.err (!%p1710_p11)
}
  0x54   :  { %70 = dma.hbm_to_vmem [thread:$0]  %s2093_s4, 1024, %s65_s24, [#allocation10], %s1748_s1, %s1748_s1, %s1749_s21  }
  0x55   :  { %1736 = dma.done.wait [#allocation4], 64  }
  0x56   :  { %1737 = vsyncadd [#allocation4], 4294967232 }
  0x57   :  { %1738 = dma.done.wait [#allocation7], 8320  }
  0x58   :  { %1739 = vsyncadd [#allocation7], 4294958976 }
  0x59   :  { %1740 = dma.done.wait [#allocation10], 2048  }
  0x5a   :  { %1741 = vsyncadd [#allocation10], 4294965248  ;;  %v1753_v0 = vmov 0   ;;  %v90_v1 = vld [vmem:[#allocation6] sm:$0xff]  ;;  %v91_v26 = vld [vmem:[#allocation6 + $0x8] sm:$0xff]  ;;  %vm1755_vm0 = vmmov 0  }
  0x5b   :  { %548 = vmatprep.mubr.bf16.mxu0 %v1753_v0  ;;  %589 = vmatprep.mubr.bf16.mxu1 %v1753_v0  ;;  %v94_v2 = vld [vmem:[#allocation6 + $0x20] sm:$0xff]  ;;  %v95_v27 = vld [vmem:[#allocation6 + $0x28] sm:$0xff]  ;;  %v92_v43 = vld [vmem:[#allocation6 + $0x10] sm:$0xff]  ;;  %s1756_s21 = smov [#allocation12]  }
  0x5c   :  { %v98_v3 = vld [vmem:[#allocation6 + $0x40] sm:$0xff]  ;;  %v1234_v4 = vcombine.high %v90_v1, %v94_v2  ;;  %v1233_v5 = vcombine.low %v90_v1, %v94_v2  ;;  %v99_v28 = vld [vmem:[#allocation6 + $0x48] sm:$0xff]  ;;  %v1236_v30 = vcombine.high %v91_v26, %v95_v27  ;;  %v1235_v31 = vcombine.low %v91_v26, %v95_v27  ;;  %v96_v44 = vld [vmem:[#allocation6 + $0x30] sm:$0xff]  ;;  %s1222_s10 = sshll.u32 %s1756_s21, 4  ;;  %s1223_s10 = int_to_ptr.vmem [resolvable:$true] %s1222_s10 }
  0x5d   :  { %v102_v6 = vld [vmem:[#allocation6 + $0x60] sm:$0xff]  ;;  %v103_v32 = vld [vmem:[#allocation6 + $0x68] sm:$0xff]  ;;  %v1238_v50 = vcombine.high %v92_v43, %v96_v44  ;;  %v100_v51 = vld [vmem:[#allocation6 + $0x50] sm:$0xff]  ;;  %v1237_v57 = vcombine.low %v92_v43, %v96_v44  ;;  %s1714_s3 = scalar_lea.vmem %s1223_s10, 128  ;;  %p1719_p13 = scmp.lt.s32.totalorder %s1223_s10, %s1223_s10 }
  0x5e   :  { %v1242_v7 = vcombine.high %v98_v3, %v102_v6  ;;  %v106_v8 = vld [vmem:[#allocation6 + $0x80] sm:$0xff]  ;;  %516 = vmatprep.subr.bf16.mxu0 %v1234_v4  ;;  %v1241_v10 = vcombine.low %v98_v3, %v102_v6  ;;  %v1244_v34 = vcombine.high %v99_v28, %v103_v32  ;;  %v107_v35 = vld [vmem:[#allocation6 + $0x88] sm:$0xff]  ;;  %557 = vmatprep.subr.bf16.mxu1 %v1236_v30  ;;  %v104_v52 = vld [vmem:[#allocation6 + $0x70] sm:$0xff]  ;;  %p1715_p12 = scmp.ne.s32.totalorder %s1223_s10, %s1714_s3  ;;  %p1720_p0 = scmp.lt.s32.totalorder %s1714_s3, %s1714_s3 }
  0x5f   :  { %v110_v9 = vld [vmem:[#allocation6 + $0xa0] sm:$0xff]  ;;  %517 = vmatpush1.bf16.msra.mxu0 %v1233_v5  ;;  %v111_v36 = vld [vmem:[#allocation6 + $0xa8] sm:$0xff]  ;;  %558 = vmatpush1.bf16.msra.mxu1 %v1235_v31  ;;  %v1243_v39 = vcombine.low %v99_v28, %v103_v32  ;;  %v1860_v56 = vld [vmem:[#allocation3] sm:$0xf]  ;;  %v1246_v58 = vcombine.high %v100_v51, %v104_v52  ;;  %v1245_v2 = vcombine.low %v100_v51, %v104_v52  ;;  %v1754_v32 = vmov 0.0  }
  0x60   :  { %518 = vmatprep.subr.bf16.mxu0 %v1242_v7  ;;  %v1250_v11 = vcombine.high %v106_v8, %v110_v9  ;;  %v114_v12 = vld [vmem:[#allocation6 + $0xc0] sm:$0xff]  ;;  %v1249_v14 = vcombine.low %v106_v8, %v110_v9  ;;  %v115_v40 = vld [vmem:[#allocation6 + $0xc8] sm:$0xff]  ;;  %559 = vmatprep.subr.bf16.mxu1 %v1244_v34  ;;  %v1252_v45 = vcombine.high %v107_v35, %v111_v36  ;;  %v108_v62 = vld [vmem:[#allocation6 + $0x90] sm:$0xff]  ;;  %p1721_p1 = por %p1720_p0, %p1719_p13 }
  0x61   :  { %v118_v13 = vld [vmem:[#allocation6 + $0xe0] sm:$0xff]  ;;  %v119_v41 = vld [vmem:[#allocation6 + $0xe8] sm:$0xff]  ;;  %v1251_v47 = vcombine.low %v107_v35, %v111_v36  ;;  %v112_v63 = vld [vmem:[#allocation6 + $0xb0] sm:$0xff] }
  0x62   :  { %v1258_v15 = vcombine.high %v114_v12, %v118_v13  ;;  %v122_v16 = vld [vmem:[#allocation6 + $0x100] sm:$0xff]  ;;  %v1257_v18 = vcombine.low %v114_v12, %v118_v13  ;;  %v1260_v49 = vcombine.high %v115_v40, %v119_v41  ;;  %v123_v53 = vld [vmem:[#allocation6 + $0x108] sm:$0xff]  ;;  %v1259_v55 = vcombine.low %v115_v40, %v119_v41  ;;  %v116_v7 = vld [vmem:[#allocation6 + $0xd0] sm:$0xff]  ;;  %p1722_p2 = pnand %p1721_p1, %p1715_p12 }
  0x63   :  { %519 = vmatpush1.bf16.msra.mxu0 %v1241_v10  ;;  %v126_v17 = vld [vmem:[#allocation6 + $0x120] sm:$0xff]  ;;  %560 = vmatpush1.bf16.msra.mxu1 %v1243_v39  ;;  %v127_v54 = vld [vmem:[#allocation6 + $0x128] sm:$0xff]  ;;  %v1254_v4 = vcombine.high %v108_v62, %v112_v63  ;;  %v120_v8 = vld [vmem:[#allocation6 + $0xf0] sm:$0xff]  ;;  %v1253_v10 = vcombine.low %v108_v62, %v112_v63 }
  0x64   :  { %520 = vmatprep.subr.bf16.mxu0 %v1250_v11  ;;  %v1266_v19 = vcombine.high %v122_v16, %v126_v17  ;;  %v130_v20 = vld [vmem:[#allocation6 + $0x140] sm:$0xff]  ;;  %v1265_v22 = vcombine.low %v122_v16, %v126_v17  ;;  %561 = vmatprep.subr.bf16.mxu1 %v1252_v45  ;;  %v1268_v59 = vcombine.high %v123_v53, %v127_v54  ;;  %v131_v60 = vld [vmem:[#allocation6 + $0x148] sm:$0xff]  ;;  %v124_v13 = vld [vmem:[#allocation6 + $0x110] sm:$0xff] }
  0x65   :  { %v134_v21 = vld [vmem:[#allocation6 + $0x160] sm:$0xff]  ;;  %v135_v61 = vld [vmem:[#allocation6 + $0x168] sm:$0xff]  ;;  %v1267_v1 = vcombine.low %v123_v53, %v127_v54  ;;  %v1262_v12 = vcombine.high %v116_v7, %v120_v8  ;;  %v1261_v16 = vcombine.low %v116_v7, %v120_v8  ;;  %v148_v26 = vld [vmem:[#allocation6 + $0x1d0] sm:$0xff] }
  0x66   :  { %v1274_v23 = vcombine.high %v130_v20, %v134_v21  ;;  %v138_v24 = vld [vmem:[#allocation6 + $0x180] sm:$0xff]  ;;  %v1273_v29 = vcombine.low %v130_v20, %v134_v21  ;;  %v1276_v3 = vcombine.high %v131_v60, %v135_v61  ;;  %v139_v5 = vld [vmem:[#allocation6 + $0x188] sm:$0xff]  ;;  %v1275_v9 = vcombine.low %v131_v60, %v135_v61  ;;  %v152_v27 = vld [vmem:[#allocation6 + $0x1f0] sm:$0xff] }
  0x67   :  { %521 = vmatpush1.bf16.msra.mxu0 %v1249_v14  ;;  %v142_v25 = vld [vmem:[#allocation6 + $0x1a0] sm:$0xff]  ;;  %562 = vmatpush1.bf16.msra.mxu1 %v1251_v47  ;;  %v143_v6 = vld [vmem:[#allocation6 + $0x1a8] sm:$0xff]  ;;  %v128_v14 = vld [vmem:[#allocation6 + $0x130] sm:$0xff]  ;;  %v1293_v30 = vcombine.low %v148_v26, %v152_v27 }
  0x68   :  { %522 = vmatprep.subr.bf16.mxu0 %v1258_v15  ;;  %v1282_v33 = vcombine.high %v138_v24, %v142_v25  ;;  %v146_v37 = vld [vmem:[#allocation6 + $0x1c0] sm:$0xff]  ;;  %v1281_v42 = vcombine.low %v138_v24, %v142_v25  ;;  %563 = vmatprep.subr.bf16.mxu1 %v1260_v49  ;;  %v1284_v11 = vcombine.high %v139_v5, %v143_v6  ;;  %v1864_v31 = vld [vmem:[#allocation9] sm:$0xff]   ;;  %v1875_v34 = vld [vmem:[#allocation9 + $0x10] sm:$0xff]  }
  0x69   :  { %v150_v38 = vld [vmem:[#allocation6 + $0x1e0] sm:$0xff]  ;;  %v1283_v15 = vcombine.low %v139_v5, %v143_v6  ;;  %v1270_v17 = vcombine.high %v124_v13, %v128_v14  ;;  %v1269_v20 = vcombine.low %v124_v13, %v128_v14  ;;  %v1883_v36 = vld [vmem:[#allocation9 + $0x20] sm:$0xff]   ;;  %v93_v44 = vld [vmem:[#allocation6 + $0x18] sm:$0xff] }
  0x6a   :  { %v1290_v46 = vcombine.high %v146_v37, %v150_v38  ;;  %v1289_v48 = vcombine.low %v146_v37, %v150_v38  ;;  %v1879_v35 = vld [vmem:[#allocation9 + $0x18] sm:$0xff]   ;;  %v1887_v37 = vld [vmem:[#allocation9 + $0x28] sm:$0xff]   ;;  %v1891_v38 = vld [vmem:[#allocation9 + $0x30] sm:$0xff]  }
  0x6b   :  { %523 = vmatpush1.bf16.msra.mxu0 %v1257_v18  ;;  %564 = vmatpush1.bf16.msra.mxu1 %v1259_v55  ;;  %v132_v18 = vld [vmem:[#allocation6 + $0x150] sm:$0xff]  ;;  %v1895_v39 = vld [vmem:[#allocation9 + $0x38] sm:$0xff]   ;;  %v147_v40 = vld [vmem:[#allocation6 + $0x1c8] sm:$0xff] }
  0x6c   :  { %524 = vmatprep.subr.bf16.mxu0 %v1266_v19  ;;  %565 = vmatprep.subr.bf16.mxu1 %v1268_v59  ;;  %v136_v19 = vld [vmem:[#allocation6 + $0x170] sm:$0xff]  ;;  %v151_v41 = vld [vmem:[#allocation6 + $0x1e8] sm:$0xff]  ;;  %v97_v45 = vld [vmem:[#allocation6 + $0x38] sm:$0xff] }
  0x6d   :  { %v1278_v21 = vcombine.high %v132_v18, %v136_v19  ;;  %v1277_v24 = vcombine.low %v132_v18, %v136_v19  ;;  %v1291_v43 = vcombine.low %v147_v40, %v151_v41  ;;  %v1240_v47 = vcombine.high %v93_v44, %v97_v45  ;;  %v105_v49 = vld [vmem:[#allocation6 + $0x78] sm:$0xff] }
  0x6e   :  { %v109_v51 = vld [vmem:[#allocation6 + $0x98] sm:$0xff] }
  0x6f   :  { %525 = vmatpush1.bf16.msra.mxu0 %v1265_v22  ;;  %566 = vmatpush1.bf16.msra.mxu1 %v1267_v1  ;;  %v140_v22 = vld [vmem:[#allocation6 + $0x190] sm:$0xff]  ;;  %v113_v52 = vld [vmem:[#allocation6 + $0xb8] sm:$0xff] }
  0x70   :  { %526 = vmatprep.subr.bf16.mxu0 %v1274_v23  ;;  %567 = vmatprep.subr.bf16.mxu1 %v1276_v3  ;;  %v144_v23 = vld [vmem:[#allocation6 + $0x1b0] sm:$0xff]  ;;  %v1256_v54 = vcombine.high %v109_v51, %v113_v52  ;;  %v117_v55 = vld [vmem:[#allocation6 + $0xd8] sm:$0xff] }
  0x71   :  { %v1286_v25 = vcombine.high %v140_v22, %v144_v23  ;;  %v1285_v28 = vcombine.low %v140_v22, %v144_v23  ;;  %v125_v60 = vld [vmem:[#allocation6 + $0x118] sm:$0xff]  ;;  %v1948_v23 = vld [vmem:[#allocation8] sm:$0xff] }
  0x72   :  { %v129_v61 = vld [vmem:[#allocation6 + $0x138] sm:$0xff] }
  0x73   :  { %527 = vmatpush1.bf16.msra.mxu0 %v1273_v29  ;;  %568 = vmatpush1.bf16.msra.mxu1 %v1275_v9  ;;  %v1294_v29 = vcombine.high %v148_v26, %v152_v27  ;;  %v1272_v63 = vcombine.high %v125_v60, %v129_v61  ;;  %v133_v1 = vld [vmem:[#allocation6 + $0x158] sm:$0xff] }
  0x74   :  { %528 = vmatprep.subr.bf16.mxu0 %v1282_v33  ;;  %569 = vmatprep.subr.bf16.mxu1 %v1284_v11  ;;  %v1869_v33 = vld [vmem:[#allocation9 + $0x8] sm:$0xff]   ;;  %v145_v5 = vld [vmem:[#allocation6 + $0x1b8] sm:$0xff] }
  0x75   :  { %v149_v9 = vld [vmem:[#allocation6 + $0x1d8] sm:$0xff] }
  0x77   :  { %529 = vmatpush1.bf16.msra.mxu0 %v1281_v42  ;;  %570 = vmatpush1.bf16.msra.mxu1 %v1283_v15  ;;  %v1292_v42 = vcombine.high %v147_v40, %v151_v41 }
  0x78   :  { %530 = vmatprep.subr.bf16.mxu0 %v1290_v46  ;;  %v1239_v46 = vcombine.low %v93_v44, %v97_v45 }
  0x79   :  { %571 = vmatprep.subr.bf16.mxu1 %v1292_v42 }
  0x7b   :  { %531 = vmatpush1.bf16.msra.mxu0 %v1289_v48  ;;  %572 = vmatpush1.bf16.msra.mxu1 %v1291_v43  ;;  %v101_v48 = vld [vmem:[#allocation6 + $0x58] sm:$0xff] }
  0x7c   :  { %598 = vmatprep.subr.bf16.mxu0 %v1238_v50  ;;  %v1248_v50 = vcombine.high %v101_v48, %v105_v49  ;;  %639 = vmatprep.subr.bf16.mxu1 %v1240_v47  ;;  %v1247_v53 = vcombine.low %v101_v48, %v105_v49 }
  0x7e   :  { %549 = vmatmul.mubr.bf16.vlgmr.msra.gmra.mrb[0].mxu0 %v1860_v56  ;;  %590 = vmatmul.mubr.bf16.vlgmr.msra.gmra.mrb[0].mxu1 %v1860_v56 }
  0x7f   :  { %599 = vmatpush1.bf16.msra.mxu0 %v1237_v57  ;;  %630 = vmatprep.mubr.bf16.mxu0 %v1753_v0  ;;  %v121_v57 = vld [vmem:[#allocation6 + $0xf8] sm:$0xff] }
  0x80   :  { %600 = vmatprep.subr.bf16.mxu0 %v1246_v58  ;;  %640 = vmatpush1.bf16.msra.mxu1 %v1239_v46  ;;  %v1255_v58 = vcombine.low %v109_v51, %v113_v52  ;;  %v1264_v59 = vcombine.high %v117_v55, %v121_v57  ;;  %v1263_v62 = vcombine.low %v117_v55, %v121_v57 }
  0x81   :  { %641 = vmatprep.subr.bf16.mxu1 %v1248_v50  ;;  %671 = vmatprep.mubr.bf16.mxu1 %v1753_v0 }
  0x83   :  { %601 = vmatpush1.bf16.msra.mxu0 %v1245_v2  ;;  %v1271_v2 = vcombine.low %v125_v60, %v129_v61 }
  0x84   :  { %602 = vmatprep.subr.bf16.mxu0 %v1254_v4  ;;  %642 = vmatpush1.bf16.msra.mxu1 %v1247_v53  ;;  %v141_v4 = vld [vmem:[#allocation6 + $0x198] sm:$0xff] }
  0x85   :  { %643 = vmatprep.subr.bf16.mxu1 %v1256_v54  ;;  %v1288_v7 = vcombine.high %v141_v4, %v145_v5  ;;  %v1287_v8 = vcombine.low %v141_v4, %v145_v5 }
  0x87   :  { %603 = vmatpush1.bf16.msra.mxu0 %v1253_v10  ;;  %v153_v10 = vld [vmem:[#allocation6 + $0x1f8] sm:$0xff] }
  0x88   :  { %604 = vmatprep.subr.bf16.mxu0 %v1262_v12  ;;  %644 = vmatpush1.bf16.msra.mxu1 %v1255_v58  ;;  %v1296_v11 = vcombine.high %v149_v9, %v153_v10  ;;  %v1295_v12 = vcombine.low %v149_v9, %v153_v10 }
  0x89   :  { %645 = vmatprep.subr.bf16.mxu1 %v1264_v59 }
  0x8b   :  { %605 = vmatpush1.bf16.msra.mxu0 %v1261_v16 }
  0x8c   :  { %606 = vmatprep.subr.bf16.mxu0 %v1270_v17  ;;  %646 = vmatpush1.bf16.msra.mxu1 %v1263_v62 }
  0x8d   :  { %647 = vmatprep.subr.bf16.mxu1 %v1272_v63 }
  0x8f   :  { %607 = vmatpush1.bf16.msra.mxu0 %v1269_v20  ;;  %v156_v20 = vlaneseq }
  0x90   :  { %608 = vmatprep.subr.bf16.mxu0 %v1278_v21  ;;  %648 = vmatpush1.bf16.msra.mxu1 %v1271_v2 }
  0x91   :  { %v1945_v21 = vshrl.u32 %v156_v20, 7 }
  0x93   :  { %609 = vmatpush1.bf16.msra.mxu0 %v1277_v24  ;;  %v158_v22 = vsub.s32 0, %v1945_v21  ;;  %v162_v50 = vsub.s32 1, %v1945_v21  ;;  %v166_v61 = vsub.s32 2, %v1945_v21 }
  0x94   :  { %610 = vmatprep.subr.bf16.mxu0 %v1286_v25 }
  0x95   :  { %v159_v24 = vrot.slane %v1948_v23, %v158_v22  ;;  %v163_v51 = vrot.slane %v1948_v23, %v162_v50  ;;  %v167_v62 = vrot.slane %v1948_v23, %v166_v61 }
  0x97   :  { %611 = vmatpush1.bf16.msra.mxu0 %v1285_v28 }
  0x98   :  { %612 = vmatprep.subr.bf16.mxu0 %v1294_v29 }
  0x9b   :  { %613 = vmatpush1.bf16.msra.mxu0 %v1293_v30 }
  0x9c   :  { %1395 = vmatprep.subr.bf16.mxu0 %v1754_v32 }
  0x9e   :  { %631 = vmatmul.mubr.bf16.vlgmr.msra.gmra.mrb[4].mxu0 %v1860_v56 }
  0x9f   :  { %1396 = vmatpush3.bf16.msra.mxu0 %v1864_v31  ;;  %1411 = vmatprep.mubr.msk.bf16.mxu0 %vm1755_vm0, %v1754_v32 }
  0xa0   :  { %1397 = vmatprep.subr.bf16.mxu0 %v1754_v32 }
  0xa3   :  { %1398 = vmatpush3.bf16.msra.mxu0 %v1869_v33 }
  0xa4   :  { %1399 = vmatprep.subr.bf16.mxu0 %v1754_v32 }
  0xa7   :  { %1400 = vmatpush3.bf16.msra.mxu0 %v1875_v34 }
  0xa8   :  { %1401 = vmatprep.subr.bf16.mxu0 %v1754_v32 }
  0xab   :  { %1402 = vmatpush3.bf16.msra.mxu0 %v1879_v35 }
  0xac   :  { %1403 = vmatprep.subr.bf16.mxu0 %v1754_v32 }
  0xaf   :  { %1404 = vmatpush3.bf16.msra.mxu0 %v1883_v36 }
  0xb0   :  { %1405 = vmatprep.subr.bf16.mxu0 %v1754_v32 }
  0xb3   :  { %1406 = vmatpush3.bf16.msra.mxu0 %v1887_v37 }
  0xb4   :  { %1407 = vmatprep.subr.bf16.mxu0 %v1754_v32 }
  0xb7   :  { %1408 = vmatpush3.bf16.msra.mxu0 %v1891_v38 }
  0xb8   :  { %1409 = vmatprep.subr.bf16.mxu0 %v1754_v32 }
  0xbb   :  { %1410 = vmatpush3.bf16.msra.mxu0 %v1895_v39 }
  0xbc   :  { %1435 = vmatprep.subr.bf16.mxu0 %v1754_v32 }
  0xbe   :  { %1412 = vmatmul.mubr.bf16.vlgmr.msra.gmra.mrb[8].mxu0 %v1753_v0  ;;  %v137_v0 = vld [vmem:[#allocation6 + $0x178] sm:$0xff] }
  0xbf   :  { %1436 = vmatpush3.bf16.msra.mxu0 %v1864_v31  ;;  %1451 = vmatprep.mubr.msk.bf16.mxu0 %vm1755_vm0, %v1754_v32  ;;  %v1280_v3 = vcombine.high %v133_v1, %v137_v0  ;;  %v1279_v6 = vcombine.low %v133_v1, %v137_v0 }
  0xc0   :  { %1437 = vmatprep.subr.bf16.mxu0 %v1754_v32 }
  0xc1   :  { %649 = vmatprep.subr.bf16.mxu1 %v1280_v3 }
  0xc2   :  { %650 = vmatpush1.bf16.msra.mxu1 %v1279_v6 }
  0xc3   :  { %1438 = vmatpush3.bf16.msra.mxu0 %v1869_v33  ;;  %651 = vmatprep.subr.bf16.mxu1 %v1288_v7  ;;  %v170_v7 = vsub.s32 3, %v1945_v21 }
  0xc4   :  { %1439 = vmatprep.subr.bf16.mxu0 %v1754_v32 }
  0xc6   :  { %652 = vmatpush1.bf16.msra.mxu1 %v1287_v8  ;;  %v171_v8 = vrot.slane %v1948_v23, %v170_v7 }
  0xc7   :  { %1440 = vmatpush3.bf16.msra.mxu0 %v1875_v34  ;;  %653 = vmatprep.subr.bf16.mxu1 %v1296_v11 }
  0xc8   :  { %1441 = vmatprep.subr.bf16.mxu0 %v1754_v32 }
  0xca   :  { %654 = vmatpush1.bf16.msra.mxu1 %v1295_v12 }
  0xcb   :  { %1442 = vmatpush3.bf16.msra.mxu0 %v1879_v35  ;;  %1415 = vmatprep.subr.bf16.mxu1 %v1754_v32 }
  0xcc   :  { %1443 = vmatprep.subr.bf16.mxu0 %v1754_v32 }
  0xcd   :  { %672 = vmatmul.mubr.bf16.vlgmr.msra.gmra.mrb[4].mxu1 %v1860_v56 }
  0xce   :  { %1416 = vmatpush3.bf16.msra.mxu1 %v1864_v31  ;;  %1431 = vmatprep.mubr.msk.bf16.mxu1 %vm1755_vm0, %v1754_v32 }
  0xcf   :  { %1444 = vmatpush3.bf16.msra.mxu0 %v1883_v36  ;;  %1417 = vmatprep.subr.bf16.mxu1 %v1754_v32 }
  0xd0   :  { %1445 = vmatprep.subr.bf16.mxu0 %v1754_v32 }
  0xd2   :  { %1418 = vmatpush3.bf16.msra.mxu1 %v1869_v33 }
  0xd3   :  { %1446 = vmatpush3.bf16.msra.mxu0 %v1887_v37  ;;  %1419 = vmatprep.subr.bf16.mxu1 %v1754_v32 }
  0xd4   :  { %1447 = vmatprep.subr.bf16.mxu0 %v1754_v32 }
  0xd6   :  { %1420 = vmatpush3.bf16.msra.mxu1 %v1875_v34 }
  0xd7   :  { %1448 = vmatpush3.bf16.msra.mxu0 %v1891_v38  ;;  %1421 = vmatprep.subr.bf16.mxu1 %v1754_v32 }
  0xd8   :  { %1449 = vmatprep.subr.bf16.mxu0 %v1754_v32 }
  0xda   :  { %1422 = vmatpush3.bf16.msra.mxu1 %v1879_v35 }
  0xdb   :  { %1450 = vmatpush3.bf16.msra.mxu0 %v1895_v39  ;;  %1423 = vmatprep.subr.bf16.mxu1 %v1754_v32 }
  0xdc   :  { %1475 = vmatprep.subr.bf16.mxu0 %v1754_v32 }
  0xde   :  { %1424 = vmatpush3.bf16.msra.mxu1 %v1883_v36 }
  0xdf   :  { %1425 = vmatprep.subr.bf16.mxu1 %v1754_v32 }
  0xe2   :  { %1426 = vmatpush3.bf16.msra.mxu1 %v1887_v37 }
  0xe3   :  { %1427 = vmatprep.subr.bf16.mxu1 %v1754_v32 }
  0xe6   :  { %1428 = vmatpush3.bf16.msra.mxu1 %v1891_v38 }
  0xe7   :  { %1429 = vmatprep.subr.bf16.mxu1 %v1754_v32 }
  0xea   :  { %1430 = vmatpush3.bf16.msra.mxu1 %v1895_v39 }
  0xeb   :  { %1455 = vmatprep.subr.bf16.mxu1 %v1754_v32 }
 0x151   :  { %v550_v56 = vpop.f32.mrb[0].mxu0  ;;  %v591_v42 = vpop.f32.mrb[0].mxu1 }
 0x152   :  { %v552_v13 = vpop.f32.mrb[1].mxu0  ;;  %v551_v25 = vadd.f32 %v550_v56, %v159_v24  ;;  %v1962_v43 = vpop.f32.mrb[1].mxu1  ;;  %v592_v63 = vadd.f32 %v591_v42, %v167_v62  ;;  %v1598_v42 = vld [vmem:[#allocation11 + $0x10] sm:$0xff]  }
 0x153   :  { %v554_v14 = vpop.f32.mrb[2].mxu0  ;;  %v595_v44 = vpop.f32.mrb[2].mxu1  ;;  %v553_v52 = vadd.f32 %v552_v13, %v163_v51  ;;  %v594_v9 = vadd.f32 %v1962_v43, %v171_v8  ;;  %v1600_v43 = vld [vmem:[#allocation11 + $0x20] sm:$0xff]  }
 0x154   :  { %v555_v15 = vpop.f32.mrb[3].mxu0  ;;  %v596_v45 = vpop.f32.mrb[3].mxu1  ;;  %v1601_v44 = vld [vmem:[#allocation11 + $0x28] sm:$0xff]  }
 0x155   :  { %v182_v45 = vsub.s32 6, %v1945_v21 }
 0x171   :  { %v1941_v16 = vpop.f32.mrb[4].mxu0 }
 0x172   :  { %v1943_v17 = vpop.f32.mrb[5].mxu0 }
 0x173   :  { %v636_v18 = vpop.f32.mrb[6].mxu0 }
 0x174   :  { %v637_v19 = vpop.f32.mrb[7].mxu0  ;;  %v174_v18 = vsub.s32 4, %v1945_v21 }
 0x176   :  { %v175_v19 = vrot.slane %v1948_v23, %v174_v18 }
 0x178   :  { %v633_v20 = vadd.f32 %v1941_v16, %v175_v19 }
 0x191   :  { %v787_v26 = vpop.f32.mrb[8].mxu0 }
 0x192   :  { %v793_v27 = vadd.f32 %v787_v26, %v551_v25  ;;  %v1413_v28 = vpop.f32.mrb[9].mxu0 }
 0x193   :  { %v790_v29 = vpop.f32.mrb[10].mxu0 }
 0x194   :  { %v794_v30 = vmax.f32 %v793_v27, 0.0  ;;  %v1414_v40 = vpop.f32.mrb[11].mxu0 }
 0x196   :  { %v796_v41 = vpack.c.bf16 %v794_v30, %v794_v30 }
 0x198   :  { %1432 = vmatmul.mubr.bf16.vlgmr.msra.gmra.mrb[8].mxu1 %v796_v41 }
 0x199   :  { %1456 = vmatpush3.bf16.msra.mxu1 %v1864_v31  ;;  %1471 = vmatprep.mubr.msk.bf16.mxu1 %vm1755_vm0, %v1754_v32 }
 0x19a   :  { %1457 = vmatprep.subr.bf16.mxu1 %v1754_v32 }
 0x19d   :  { %1458 = vmatpush3.bf16.msra.mxu1 %v1869_v33 }
 0x19e   :  { %1459 = vmatprep.subr.bf16.mxu1 %v1754_v32 }
 0x1a0   :  { %v1971_v46 = vpop.f32.mrb[4].mxu1 }
 0x1a1   :  { %1460 = vmatpush3.bf16.msra.mxu1 %v1875_v34  ;;  %v1973_v47 = vpop.f32.mrb[5].mxu1 }
 0x1a2   :  { %1461 = vmatprep.subr.bf16.mxu1 %v1754_v32  ;;  %v677_v48 = vpop.f32.mrb[6].mxu1 }
 0x1a3   :  { %v678_v49 = vpop.f32.mrb[7].mxu1  ;;  %v183_v48 = vrot.slane %v1948_v23, %v182_v45 }
 0x1a5   :  { %1462 = vmatpush3.bf16.msra.mxu1 %v1879_v35  ;;  %v674_v49 = vadd.f32 %v1971_v46, %v183_v48 }
 0x1a6   :  { %1463 = vmatprep.subr.bf16.mxu1 %v1754_v32 }
 0x1a9   :  { %1464 = vmatpush3.bf16.msra.mxu1 %v1883_v36 }
 0x1aa   :  { %1465 = vmatprep.subr.bf16.mxu1 %v1754_v32 }
 0x1ad   :  { %1466 = vmatpush3.bf16.msra.mxu1 %v1887_v37 }
 0x1ae   :  { %1467 = vmatprep.subr.bf16.mxu1 %v1754_v32 }
 0x1b1   :  { %1468 = vmatpush3.bf16.msra.mxu1 %v1891_v38 }
 0x1b2   :  { %1469 = vmatprep.subr.bf16.mxu1 %v1754_v32 }
 0x1b5   :  { %1470 = vmatpush3.bf16.msra.mxu1 %v1895_v39 }
 0x1b6   :  { %1495 = vmatprep.subr.bf16.mxu1 %v1754_v32 }
 0x26b   :  { %v831_v53 = vpop.f32.mrb[8].mxu1 }
 0x26c   :  { %v837_v54 = vadd.f32 %v831_v53, %v553_v52  ;;  %v1433_v55 = vpop.f32.mrb[9].mxu1 }
 0x26d   :  { %v834_v57 = vpop.f32.mrb[10].mxu1 }
 0x26e   :  { %v838_v58 = vmax.f32 %v837_v54, 0.0  ;;  %v1434_v59 = vpop.f32.mrb[11].mxu1 }
 0x26f   :  { %v1603_v59 = vld [vmem:[#allocation11 + $0x38] sm:$0xff]  }
 0x270   :  { %v840_v60 = vpack.c.bf16 %v838_v58, %v838_v58  ;;  %v1602_v58 = vld [vmem:[#allocation11 + $0x30] sm:$0xff]  }
 0x272   :  { %1452 = vmatmul.mubr.bf16.vlgmr.msra.gmra.mrb[12].mxu0 %v840_v60  ;;  %v186_v60 = vsub.s32 7, %v1945_v21 }
 0x273   :  { %1476 = vmatpush3.bf16.msra.mxu0 %v1864_v31  ;;  %1491 = vmatprep.mubr.msk.bf16.mxu0 %vm1755_vm0, %v1754_v32 }
 0x274   :  { %1477 = vmatprep.subr.bf16.mxu0 %v1754_v32  ;;  %v187_v61 = vrot.slane %v1948_v23, %v186_v60 }
 0x276   :  { %v676_v46 = vadd.f32 %v1973_v47, %v187_v61 }
 0x277   :  { %1478 = vmatpush3.bf16.msra.mxu0 %v1869_v33 }
 0x278   :  { %1479 = vmatprep.subr.bf16.mxu0 %v1754_v32 }
 0x27b   :  { %1480 = vmatpush3.bf16.msra.mxu0 %v1875_v34 }
 0x27c   :  { %1481 = vmatprep.subr.bf16.mxu0 %v1754_v32 }
 0x27f   :  { %1482 = vmatpush3.bf16.msra.mxu0 %v1879_v35 }
 0x280   :  { %1483 = vmatprep.subr.bf16.mxu0 %v1754_v32 }
 0x283   :  { %1484 = vmatpush3.bf16.msra.mxu0 %v1883_v36 }
 0x284   :  { %1485 = vmatprep.subr.bf16.mxu0 %v1754_v32 }
 0x287   :  { %1486 = vmatpush3.bf16.msra.mxu0 %v1887_v37 }
 0x288   :  { %1487 = vmatprep.subr.bf16.mxu0 %v1754_v32 }
 0x28b   :  { %1488 = vmatpush3.bf16.msra.mxu0 %v1891_v38 }
 0x28c   :  { %1489 = vmatprep.subr.bf16.mxu0 %v1754_v32 }
 0x28f   :  { %1490 = vmatpush3.bf16.msra.mxu0 %v1895_v39 }
 0x290   :  { %1515 = vmatprep.subr.bf16.mxu0 %v1754_v32 }
 0x345   :  { %v875_v1 = vpop.f32.mrb[12].mxu0 }
 0x346   :  { %v881_v0 = vadd.f32 %v875_v1, %v592_v63  ;;  %v1453_v2 = vpop.f32.mrb[13].mxu0 }
 0x347   :  { %v878_v3 = vpop.f32.mrb[14].mxu0 }
 0x348   :  { %v882_v4 = vmax.f32 %v881_v0, 0.0  ;;  %v1454_v5 = vpop.f32.mrb[15].mxu0 }
 0x34a   :  { %v884_v6 = vpack.c.bf16 %v882_v4, %v882_v4 }
 0x34c   :  { %1472 = vmatmul.mubr.bf16.vlgmr.msra.gmra.mrb[12].mxu1 %v884_v6 }
 0x34d   :  { %1496 = vmatpush3.bf16.msra.mxu1 %v1864_v31  ;;  %1511 = vmatprep.mubr.msk.bf16.mxu1 %vm1755_vm0, %v1754_v32 }
 0x34e   :  { %1497 = vmatprep.subr.bf16.mxu1 %v1754_v32 }
 0x351   :  { %1498 = vmatpush3.bf16.msra.mxu1 %v1869_v33 }
 0x352   :  { %1499 = vmatprep.subr.bf16.mxu1 %v1754_v32 }
 0x355   :  { %1500 = vmatpush3.bf16.msra.mxu1 %v1875_v34 }
 0x356   :  { %1501 = vmatprep.subr.bf16.mxu1 %v1754_v32 }
 0x359   :  { %1502 = vmatpush3.bf16.msra.mxu1 %v1879_v35 }
 0x35a   :  { %1503 = vmatprep.subr.bf16.mxu1 %v1754_v32 }
 0x35d   :  { %1504 = vmatpush3.bf16.msra.mxu1 %v1883_v36 }
 0x35e   :  { %1505 = vmatprep.subr.bf16.mxu1 %v1754_v32 }
 0x361   :  { %1506 = vmatpush3.bf16.msra.mxu1 %v1887_v37 }
 0x362   :  { %1507 = vmatprep.subr.bf16.mxu1 %v1754_v32 }
 0x365   :  { %1508 = vmatpush3.bf16.msra.mxu1 %v1891_v38 }
 0x366   :  { %1509 = vmatprep.subr.bf16.mxu1 %v1754_v32 }
 0x369   :  { %1510 = vmatpush3.bf16.msra.mxu1 %v1895_v39 }
 0x36a   :  { %1535 = vmatprep.subr.bf16.mxu1 %v1754_v32 }
 0x41f   :  { %v919_v10 = vpop.f32.mrb[12].mxu1 }
 0x420   :  { %v925_v11 = vadd.f32 %v919_v10, %v594_v9  ;;  %v1473_v12 = vpop.f32.mrb[13].mxu1 }
 0x421   :  { %v922_v56 = vpop.f32.mrb[14].mxu1 }
 0x422   :  { %v926_v13 = vmax.f32 %v925_v11, 0.0  ;;  %v1474_v14 = vpop.f32.mrb[15].mxu1 }
 0x424   :  { %v928_v15 = vpack.c.bf16 %v926_v13, %v926_v13 }
 0x426   :  { %1492 = vmatmul.mubr.bf16.vlgmr.msra.gmra.mrb[16].mxu0 %v928_v15 }
 0x427   :  { %1516 = vmatpush3.bf16.msra.mxu0 %v1864_v31  ;;  %1531 = vmatprep.mubr.msk.bf16.mxu0 %vm1755_vm0, %v1754_v32 }
 0x428   :  { %1517 = vmatprep.subr.bf16.mxu0 %v1754_v32 }
 0x42b   :  { %1518 = vmatpush3.bf16.msra.mxu0 %v1869_v33 }
 0x42c   :  { %1519 = vmatprep.subr.bf16.mxu0 %v1754_v32 }
 0x42f   :  { %1520 = vmatpush3.bf16.msra.mxu0 %v1875_v34 }
 0x430   :  { %1521 = vmatprep.subr.bf16.mxu0 %v1754_v32 }
 0x433   :  { %1522 = vmatpush3.bf16.msra.mxu0 %v1879_v35 }
 0x434   :  { %1523 = vmatprep.subr.bf16.mxu0 %v1754_v32 }
 0x437   :  { %1524 = vmatpush3.bf16.msra.mxu0 %v1883_v36 }
 0x438   :  { %1525 = vmatprep.subr.bf16.mxu0 %v1754_v32 }
 0x43b   :  { %1526 = vmatpush3.bf16.msra.mxu0 %v1887_v37 }
 0x43c   :  { %1527 = vmatprep.subr.bf16.mxu0 %v1754_v32 }
 0x43f   :  { %1528 = vmatpush3.bf16.msra.mxu0 %v1891_v38 }
 0x440   :  { %1529 = vmatprep.subr.bf16.mxu0 %v1754_v32 }
 0x443   :  { %1530 = vmatpush3.bf16.msra.mxu0 %v1895_v39 }
 0x444   :  { %1555 = vmatprep.subr.bf16.mxu0 %v1754_v32 }
 0x4f9   :  { %v963_v22 = vpop.f32.mrb[16].mxu0 }
 0x4fa   :  { %v969_v24 = vadd.f32 %v963_v22, %v633_v20  ;;  %v1493_v25 = vpop.f32.mrb[17].mxu0 }
 0x4fb   :  { %v966_v26 = vpop.f32.mrb[18].mxu0 }
 0x4fc   :  { %v970_v27 = vmax.f32 %v969_v24, 0.0  ;;  %v1494_v28 = vpop.f32.mrb[19].mxu0 }
 0x4fe   :  { %v972_v29 = vpack.c.bf16 %v970_v27, %v970_v27 }
 0x500   :  { %1512 = vmatmul.mubr.bf16.vlgmr.msra.gmra.mrb[16].mxu1 %v972_v29 }
 0x501   :  { %1536 = vmatpush3.bf16.msra.mxu1 %v1864_v31  ;;  %1551 = vmatprep.mubr.msk.bf16.mxu1 %vm1755_vm0, %v1754_v32  ;;  %v178_v31 = vsub.s32 5, %v1945_v21 }
 0x502   :  { %1537 = vmatprep.subr.bf16.mxu1 %v1754_v32 }
 0x505   :  { %1538 = vmatpush3.bf16.msra.mxu1 %v1869_v33  ;;  %v179_v33 = vrot.slane %v1948_v23, %v178_v31 }
 0x506   :  { %1539 = vmatprep.subr.bf16.mxu1 %v1754_v32 }
 0x509   :  { %1540 = vmatpush3.bf16.msra.mxu1 %v1875_v34  ;;  %v635_v34 = vadd.f32 %v1943_v17, %v179_v33  ;;  %v1599_v17 = vld [vmem:[#allocation11 + $0x18] sm:$0xff]  }
 0x50a   :  { %1541 = vmatprep.subr.bf16.mxu1 %v1754_v32 }
 0x50d   :  { %1542 = vmatpush3.bf16.msra.mxu1 %v1879_v35 }
 0x50e   :  { %1543 = vmatprep.subr.bf16.mxu1 %v1754_v32 }
 0x511   :  { %1544 = vmatpush3.bf16.msra.mxu1 %v1883_v36 }
 0x512   :  { %1545 = vmatprep.subr.bf16.mxu1 %v1754_v32 }
 0x515   :  { %1546 = vmatpush3.bf16.msra.mxu1 %v1887_v37 }
 0x516   :  { %1547 = vmatprep.subr.bf16.mxu1 %v1754_v32 }
 0x519   :  { %1548 = vmatpush3.bf16.msra.mxu1 %v1891_v38  ;;  %v1596_v38 = vld [vmem:[#allocation11] sm:$0xff]  }
 0x51a   :  { %1549 = vmatprep.subr.bf16.mxu1 %v1754_v32 }
 0x51d   :  { %1550 = vmatpush3.bf16.msra.mxu1 %v1895_v39  ;;  %v1597_v39 = vld [vmem:[#allocation11 + $0x8] sm:$0xff]  }
 0x5d3   :  { %v1007_v35 = vpop.f32.mrb[16].mxu1 }
 0x5d4   :  { %v1013_v36 = vadd.f32 %v1007_v35, %v635_v34  ;;  %v1513_v16 = vpop.f32.mrb[17].mxu1 }
 0x5d5   :  { %v1010_v30 = vpop.f32.mrb[18].mxu1 }
 0x5d6   :  { %v1014_v40 = vmax.f32 %v1013_v36, 0.0  ;;  %v1514_v37 = vpop.f32.mrb[19].mxu1 }
 0x5d8   :  { %v1016_v41 = vpack.c.bf16 %v1014_v40, %v1014_v40 }
 0x5da   :  { %1532 = vmatmul.mubr.bf16.vlgmr.msra.gmra.mrb[20].mxu0 %v1016_v41 }
 0x5db   :  { %1571 = vmatprep.mubr.msk.bf16.mxu0 %vm1755_vm0, %v1754_v32  ;;  %1556 = vmatpush3.bf16.msra.mxu0 %v1596_v38 }
 0x5dc   :  { %1557 = vmatprep.subr.bf16.mxu0 %v1754_v32 }
 0x5df   :  { %1558 = vmatpush3.bf16.msra.mxu0 %v1597_v39 }
 0x5e0   :  { %1559 = vmatprep.subr.bf16.mxu0 %v1754_v32 }
 0x5e3   :  { %1560 = vmatpush3.bf16.msra.mxu0 %v1598_v42 }
 0x5e4   :  { %1561 = vmatprep.subr.bf16.mxu0 %v1754_v32 }
 0x5e7   :  { %1562 = vmatpush3.bf16.msra.mxu0 %v1599_v17 }
 0x5e8   :  { %1563 = vmatprep.subr.bf16.mxu0 %v1754_v32 }
 0x5eb   :  { %1564 = vmatpush3.bf16.msra.mxu0 %v1600_v43 }
 0x5ec   :  { %1565 = vmatprep.subr.bf16.mxu0 %v1754_v32 }
 0x5ef   :  { %1566 = vmatpush3.bf16.msra.mxu0 %v1601_v44 }
 0x5f0   :  { %1567 = vmatprep.subr.bf16.mxu0 %v1754_v32 }
 0x5f3   :  { %1568 = vmatpush3.bf16.msra.mxu0 %v1602_v58 }
 0x5f4   :  { %1569 = vmatprep.subr.bf16.mxu0 %v1754_v32  ;;  %v1305_v32 = vld [vmem:[%s2094_s5] ss:$0 sm:$0xff] }
 0x5f7   :  { %1570 = vmatpush3.bf16.msra.mxu0 %v1603_v59 }
 0x6ad   :  { %v1051_v50 = vpop.f32.mrb[20].mxu0 }
 0x6ae   :  { %v1057_v51 = vadd.f32 %v1051_v50, %v674_v49  ;;  %v1533_v52 = vpop.f32.mrb[21].mxu0 }
 0x6af   :  { %v1054_v53 = vpop.f32.mrb[22].mxu0 }
 0x6b0   :  { %v1058_v54 = vmax.f32 %v1057_v51, 0.0  ;;  %v1534_v55 = vpop.f32.mrb[23].mxu0 }
 0x6b2   :  { %v1060_v57 = vpack.c.bf16 %v1058_v54, %v1058_v54 }
 0x6b4   :  { %1552 = vmatmul.mubr.bf16.vlgmr.msra.gmra.mrb[20].mxu1 %v1060_v57 }
 0x787   :  { %v1095_v62 = vpop.f32.mrb[20].mxu1 }
 0x788   :  { %v1101_v63 = vadd.f32 %v1095_v62, %v676_v46  ;;  %v1553_v1 = vpop.f32.mrb[21].mxu1 }
 0x789   :  { %v1098_v0 = vpop.f32.mrb[22].mxu1 }
 0x78a   :  { %v1102_v2 = vmax.f32 %v1101_v63, 0.0  ;;  %v1554_v3 = vpop.f32.mrb[23].mxu1 }
 0x78c   :  { %v1103_v4 = vpack.c.bf16 %v1102_v2, %v1102_v2 }
 0x78e   :  { %1572 = vmatmul.mubr.bf16.vlgmr.msra.gmra.mrb[24].mxu0 %v1103_v4 }
 0x861   :  { %v1209_v5 = vpop.f32.mrb[24].mxu0 }
 0x862   :  { %v1210_v21 = vadd.f32 %v1305_v32, %v1209_v5  ;;  %v1573_v6 = vpop.f32.mrb[25].mxu0 }
 0x863   :  { %v1212_v23 = vpop.f32.mrb[26].mxu0 }
 0x864   :  { %1215 = vst [vmem:[#allocation12] sm:$0xff] %v1210_v21  ;;  %v1574_v47 = vpop.f32.mrb[27].mxu0 }
 0x865   :  { %1725 = shalt.err (!%p1722_p2)
}
 0x866   :  { %s1726_s5 = scalar_lea.hbm %s2095_s6, 128 }
 0x867   :  { %p1727_p3 = scmp.ne.s32.totalorder %s2095_s6, %s1726_s5  ;;  %p1730_p4 = scmp.lt.u32.totalorder %s1726_s5, %s2095_s6 }
 0x869   :  { %p1732_p5 = pnand %p1730_p4, %p1727_p3 }
 0x86b   :  { %1735 = shalt.err (!%p1732_p5)
}
 0x86c   :  { %1225 = dma.vmem_to_hbm [thread:$0]  %s1223_s10, 128, %s2095_s6, [#allocation5]  }
 0x86d   :  { %1742 = dma.done.wait [#allocation5], 128  }
 0x86e   :  { %1743 = vsyncadd [#allocation5], 4294967168 }
 0x86f   :  { %1229 = vsyncpa [#allocation4], 1 }
 0x870   :  { %1230 = vsyncpa [#allocation7], 1 }
 0x871   :  { %1231 = vsyncpa [#allocation10], 1 }
 0x872   :  { %1232 = vsyncpa [#allocation5], 1 }

</bundles_post_ra>
